<compile_context>
chip_gen: v6e
topology: v6e:2x2x1
jax: 0.10.0
libtpu: 0.0.40
codegen_flags: <defaults>
</compile_context>

<pallas_src>
import functools

import numpy as np
import jax
import jax.numpy as jnp
from jax.experimental import pallas as pl
from jax.experimental.pallas import tpu as pltpu


def _neighbor_subtile(xq_raw, xf_mm, inv_nf_row, *, k_v, eps, mm_dtype):
    """Neighbor aggregation for one (sub_tm, H) query slab.

    xq_raw:     (sub_tm, H) raw query rows (input dtype)
    xf_mm:      (B, H)      key/value rows, already in matmul dtype
    inv_nf_row: (1, B)      f32, 1/sqrt(sum(x_j*x_j) + H*eps) per key row
    """
    sub_tm, H = xq_raw.shape
    B = xf_mm.shape[0]

    # Query-side normalization in f32 (tiny: sub_tm rows), then cast for the MXU.
    xq32 = xq_raw.astype(jnp.float32)
    inv_nt = jax.lax.rsqrt(jnp.sum(xq32 * xq32, axis=1, keepdims=True) + H * eps)
    xqn = (xq32 * inv_nt).astype(mm_dtype)

    # Cosine scores: (xq/||xq||) @ X^T, scaled per column by 1/||x_j|| (hoisted norms).
    s = jax.lax.dot_general(xqn, xf_mm, (((1,), (1,)), ((), ())),
                            preferred_element_type=jnp.float32)        # (sub_tm, B)
    s = s * inv_nf_row

    # Softmax is row-monotone, so top-k is done directly on p = exp(s - rowmax).
    rowmax = jnp.max(s, axis=-1, keepdims=True)
    p = jnp.exp(s - rowmax)                        # max(p) == 1.0 exactly
    inv_rowsum = pl.reciprocal(jnp.sum(p, axis=-1, keepdims=True), approx=False)

    col_idx = jax.lax.broadcasted_iota(jnp.int32, (sub_tm, B), 1)
    neg = jnp.float32(-1.0)                        # finite mask sentinel (p >= 0 always)

    # k masked-argmax passes; only `work` is updated per pass (ties -> lowest index).
    work = p
    for _ in range(k_v):
        m = jnp.max(work, axis=-1, keepdims=True)
        sel = jnp.min(jnp.where(work == m, col_idx, B), axis=-1, keepdims=True)
        work = jnp.where(col_idx == sel, neg, work)

    # Second softmax over selected values v_j = p_j * inv_rowsum; the max selected value
    # is inv_rowsum (since max(p) == 1), so e_j = exp((p_j - 1) * inv_rowsum).
    U = jnp.where(work == neg, jnp.exp((p - 1.0) * inv_rowsum), 0.0)   # (sub_tm, B)
    denom = jnp.sum(U, axis=-1, keepdims=True)
    W = U * pl.reciprocal(denom, approx=False)

    # Weighted gather as W @ X on the MXU (f32 accumulation).
    return jnp.dot(W.astype(mm_dtype), xf_mm, preferred_element_type=jnp.float32)


def _find_neighbors_kernel(x_full_ref, inv_nf_ref, out_ref, *,
                           k_v, eps, tm, n_sub, mm_dtype):
    xf = x_full_ref[...]                           # (B, H), resident every step
    if xf.dtype != mm_dtype:
        xf = xf.astype(mm_dtype)
    inv_nf_row = inv_nf_ref[...]                   # (1, B), f32

    sub = tm // n_sub
    row0 = pl.program_id(0) * tm

    # Static unroll over independent sub-tiles so MXU and VPU/XLU phases can overlap.
    for t in range(n_sub):
        start = row0 + t * sub
        if sub % 8 == 0:
            start = pl.multiple_of(start, 8)
        xq = x_full_ref[pl.ds(start, sub), :]      # query rows sliced from resident X
        nb = _neighbor_subtile(xq, xf, inv_nf_row, k_v=k_v, eps=eps, mm_dtype=mm_dtype)
        out_ref[pl.ds(t * sub, sub), :] = nb.astype(out_ref.dtype)
    # Dropout(0.4) is identity at inference time.
    # TODO(synk): training-mode dropout (pltpu.prng_random_bits) not emitted.


def _choose_row_tile(B, H, itemsize, *, max_tile=512, vmem_budget=24 * 1024 * 1024):
    """Row tile: divides B, multiple of 8 (or == B), prefers grid >= 2 (v7x 2-TC sharding),
    and keeps (resident full-X + live per-step slabs) under `vmem_budget`."""
    resident = 2 * B * H * itemsize + 2 * B * 4     # double-buffered X + inv_nf row
    cands = [t for t in range(8, min(B, max_tile) + 1, 8) if B % t == 0]
    cands.sort(reverse=True)
    for prefer_multicore in (True, False):
        for tm in cands:
            if prefer_multicore and 2 * tm > B:
                continue                            # keep grid >= 2 when possible
            live = 5 * tm * B * 4 + 3 * tm * H * 4 + 2 * tm * H * itemsize
            if resident + live <= vmem_budget:
                return tm
    return cands[-1] if cands else B


def find_neighbors(sess_emb, neighbor_n, *, row_tile=None, matmul_dtype=None):
    B, H = sess_emb.shape
    k_v = max(1, min(int(neighbor_n), B))
    itemsize = sess_emb.dtype.itemsize
    eps = 1e-6

    tm = row_tile if row_tile is not None else _choose_row_tile(B, H, itemsize)
    if B % tm != 0 or (tm != B and tm % 8 != 0):
        tm = B                                      # single-block fallback
    n_sub = 2 if (tm >= 16 and tm % 16 == 0) else 1
    grid = (B // tm,)

    if matmul_dtype is not None:
        mm_dtype = matmul_dtype
    elif sess_emb.dtype == jnp.bfloat16:
        mm_dtype = jnp.bfloat16                     # native-rate MXU path
    else:
        mm_dtype = jnp.float32                      # numerically faithful path

    # Hoisted key-side norms (faithful to the PyTorch eps: sum(x*x + eps) = sum(x*x)+H*eps).
    x32 = sess_emb.astype(jnp.float32)
    inv_nf_row = jax.lax.rsqrt(jnp.sum(x32 * x32, axis=1) + H * eps).reshape(1, B)

    # VMEM estimate (resident X double-buffered + live slabs), with headroom, capped for v7x.
    est = (2 * B * H * itemsize + 2 * B * 4
           + 5 * tm * B * 4 + 3 * tm * H * 4 + 2 * tm * H * itemsize)
    vmem_limit = int(min(48 * 1024 * 1024, max(32 * 1024 * 1024, 2 * est)))

    kernel = functools.partial(_find_neighbors_kernel, k_v=k_v, eps=eps,
                               tm=tm, n_sub=n_sub, mm_dtype=mm_dtype)
    return pl.pallas_call(
        kernel,
        out_shape=jax.ShapeDtypeStruct((B, H), sess_emb.dtype),
        grid_spec=pltpu.PrefetchScalarGridSpec(
            num_scalar_prefetch=0,
            grid=grid,
            in_specs=[
                pl.BlockSpec((B, H), lambda i: (0, 0)),   # full X, resident every step
                pl.BlockSpec((1, B), lambda i: (0, 0)),   # hoisted 1/||x_j|| row, resident
            ],
            out_specs=pl.BlockSpec((tm, H), lambda i: (i, 0)),
        ),
        compiler_params=pltpu.CompilerParams(
            dimension_semantics=("parallel",),
            vmem_limit_bytes=vmem_limit,
        ),
    )(sess_emb, inv_nf_row)


def _reference(sess_emb, neighbor_n):
    """Plain-JAX reference mirroring the PyTorch forward (eval mode)."""
    x = sess_emb.astype(jnp.float32)
    B, H = x.shape
    k_v = min(int(neighbor_n), B)
    fenzi = jnp.dot(x, x.T, precision=jax.lax.Precision.HIGHEST)
    fenmu_l = jnp.sqrt(jnp.sum(x * x + 1e-6, axis=1, keepdims=True))
    fenmu = jnp.dot(fenmu_l, fenmu_l.T, precision=jax.lax.Precision.HIGHEST)
    cos_sim = jax.nn.softmax(fenzi / fenmu, axis=-1)
    vals, idx = jax.lax.top_k(cos_sim, k_v)
    w = jax.nn.softmax(vals, axis=-1)
    sess_topk = x[idx]                               # (B, k_v, H)
    return jnp.sum(w[:, :, None] * sess_topk, axis=1)


if __name__ == "__main__":
    root = jax.random.PRNGKey(0)
    k1, k2, k3 = jax.random.split(root, 3)

    # Case 1: tiny shape implied by the module (B sessions x hidden_size), f32 path.
    B1, H1, nb1 = 8, 32, 3
    x1 = jax.random.normal(k1, (B1, H1), dtype=jnp.float32)
    out1 = jax.block_until_ready(find_neighbors(x1, nb1))
    np.testing.assert_allclose(np.asarray(out1), np.asarray(_reference(x1, nb1)),
                               rtol=1e-5, atol=1e-5)

    # Case 2: larger shape exercising the row-tiled "parallel" grid + 2x sub-tile unroll.
    B2, H2, nb2 = 512, 128, 5
    x2 = jax.random.normal(k2, (B2, H2), dtype=jnp.float32)
    out2 = jax.block_until_ready(find_neighbors(x2, nb2))
    np.testing.assert_allclose(np.asarray(out2), np.asarray(_reference(x2, nb2)),
                               rtol=1e-5, atol=1e-5)

    # Case 3: bf16 input exercises the native-rate bf16 MXU path (smoke test: finite only,
    # since bf16 score rounding can legitimately flip near-tie top-k selections).
    x3 = jax.random.normal(k3, (B2, H2), dtype=jnp.float32).astype(jnp.bfloat16)
    out3 = jax.block_until_ready(find_neighbors(x3, nb2))
    assert out3.shape == (B2, H2) and bool(jnp.all(jnp.isfinite(out3.astype(jnp.float32))))

    print("KERNEL_OK")
</pallas_src>

<mosaic_0001>
module attributes {stable_mosaic.version = 11 : i64} {
  func.func @_find_neighbors_kernel(%arg0: i32, %arg1: memref<8x32xf32, #tpu.memory_space<vmem>>, %arg2: memref<1x8xf32, #tpu.memory_space<vmem>>, %arg3: memref<8x32xf32, #tpu.memory_space<vmem>>) attributes {dimension_semantics = [#tpu.dimension_semantics<parallel>], iteration_bounds = array<i64: 1>, scalar_prefetch = 0 : i64, scratch_operands = 0 : i64, tpu.core_type = #tpu.core_type<tc>, window_params = [{pipeline_mode = #tpu.pipeline_mode<synchronous>, transform_indices = @transform_0, window_bounds = array<i64: 8, 32>}, {pipeline_mode = #tpu.pipeline_mode<synchronous>, transform_indices = @transform_1, window_bounds = array<i64: 1, 8>}, {transform_indices = @transform_2, window_bounds = array<i64: 8, 32>}]} {
    %c0 = arith.constant 0 : index
    %c0_0 = arith.constant 0 : index
    %0 = vector.load %arg1[%c0, %c0_0] : memref<8x32xf32, #tpu.memory_space<vmem>>, vector<8x32xf32>
    %c0_1 = arith.constant 0 : index
    %c0_2 = arith.constant 0 : index
    %1 = vector.load %arg2[%c0_1, %c0_2] : memref<1x8xf32, #tpu.memory_space<vmem>>, vector<1x8xf32>
    %c8_i32 = arith.constant 8 : i32
    %2 = arith.muli %arg0, %c8_i32 : i32
    %c0_i32 = arith.constant 0 : i32
    %3 = arith.addi %2, %c0_i32 : i32
    %4 = tpu.assume_multiple %3, 8 : i32
    %5 = arith.index_cast %4 : i32 to index
    %c0_3 = arith.constant 0 : index
    %6 = vector.load %arg1[%5, %c0_3] : memref<8x32xf32, #tpu.memory_space<vmem>>, vector<8x32xf32>
    %7 = arith.mulf %6, %6 : vector<8x32xf32>
    %cst = arith.constant dense<0.000000e+00> : vector<8xf32>
    %8 = vector.multi_reduction <add>, %7, %cst [1] : vector<8x32xf32> to vector<8xf32>
    %9 = vector.shape_cast %8 : vector<8xf32> to vector<8x1xf32>
    %cst_4 = arith.constant 3.200000e-05 : f32
    %10 = vector.broadcast %cst_4 : f32 to vector<8x1xf32>
    %11 = arith.addf %9, %10 : vector<8x1xf32>
    %12 = math.rsqrt %11 : vector<8x1xf32>
    %13 = vector.broadcast %12 : vector<8x1xf32> to vector<8x32xf32>
    %14 = arith.mulf %6, %13 : vector<8x32xf32>
    %cst_5 = arith.constant dense<0.000000e+00> : vector<8x8xf32>
    %15 = tpu.matmul %14, %0, %cst_5 {dimension_numbers = #tpu.dot_dimension_numbers<[1], [1], [0], [0], [0, 0, 1, 0], [], []>} : vector<8x32xf32>, vector<8x32xf32>, vector<8x8xf32> -> vector<8x8xf32>
    %16 = vector.broadcast %1 : vector<1x8xf32> to vector<8x8xf32>
    %17 = arith.mulf %15, %16 : vector<8x8xf32>
    %cst_6 = arith.constant dense<0xFF800000> : vector<8xf32>
    %18 = vector.multi_reduction <maximumf>, %17, %cst_6 [1] : vector<8x8xf32> to vector<8xf32>
    %19 = vector.shape_cast %18 : vector<8xf32> to vector<8x1xf32>
    %20 = vector.broadcast %19 : vector<8x1xf32> to vector<8x8xf32>
    %21 = arith.subf %17, %20 : vector<8x8xf32>
    %22 = math.exp %21 : vector<8x8xf32>
    %cst_7 = arith.constant dense<0.000000e+00> : vector<8xf32>
    %23 = vector.multi_reduction <add>, %22, %cst_7 [1] : vector<8x8xf32> to vector<8xf32>
    %24 = vector.shape_cast %23 : vector<8xf32> to vector<8x1xf32>
    %25 = tpu.reciprocal %24 : vector<8x1xf32> -> vector<8x1xf32>
    %26 = tpu.iota {dimensions = array<i32: 1>} : vector<8x8xi32>
    %cst_8 = arith.constant dense<0xFF800000> : vector<8xf32>
    %27 = vector.multi_reduction <maximumf>, %22, %cst_8 [1] : vector<8x8xf32> to vector<8xf32>
    %28 = vector.shape_cast %27 : vector<8xf32> to vector<8x1xf32>
    %29 = vector.broadcast %28 : vector<8x1xf32> to vector<8x8xf32>
    %30 = arith.cmpf oeq, %22, %29 : vector<8x8xf32>
    %c8_i32_9 = arith.constant 8 : i32
    %31 = vector.broadcast %c8_i32_9 : i32 to vector<8x8xi32>
    %32 = arith.select %30, %26, %31 : vector<8x8xi1>, vector<8x8xi32>
    %cst_10 = arith.constant dense<2147483647> : vector<8xi32>
    %33 = vector.multi_reduction <minsi>, %32, %cst_10 [1] : vector<8x8xi32> to vector<8xi32>
    %34 = vector.shape_cast %33 : vector<8xi32> to vector<8x1xi32>
    %35 = vector.broadcast %34 : vector<8x1xi32> to vector<8x8xi32>
    %36 = arith.cmpi eq, %26, %35 : vector<8x8xi32>
    %cst_11 = arith.constant -1.000000e+00 : f32
    %37 = vector.broadcast %cst_11 : f32 to vector<8x8xf32>
    %38 = arith.select %36, %37, %22 : vector<8x8xi1>, vector<8x8xf32>
    %cst_12 = arith.constant dense<0xFF800000> : vector<8xf32>
    %39 = vector.multi_reduction <maximumf>, %38, %cst_12 [1] : vector<8x8xf32> to vector<8xf32>
    %40 = vector.shape_cast %39 : vector<8xf32> to vector<8x1xf32>
    %41 = vector.broadcast %40 : vector<8x1xf32> to vector<8x8xf32>
    %42 = arith.cmpf oeq, %38, %41 : vector<8x8xf32>
    %c8_i32_13 = arith.constant 8 : i32
    %43 = vector.broadcast %c8_i32_13 : i32 to vector<8x8xi32>
    %44 = arith.select %42, %26, %43 : vector<8x8xi1>, vector<8x8xi32>
    %cst_14 = arith.constant dense<2147483647> : vector<8xi32>
    %45 = vector.multi_reduction <minsi>, %44, %cst_14 [1] : vector<8x8xi32> to vector<8xi32>
    %46 = vector.shape_cast %45 : vector<8xi32> to vector<8x1xi32>
    %47 = vector.broadcast %46 : vector<8x1xi32> to vector<8x8xi32>
    %48 = arith.cmpi eq, %26, %47 : vector<8x8xi32>
    %cst_15 = arith.constant -1.000000e+00 : f32
    %49 = vector.broadcast %cst_15 : f32 to vector<8x8xf32>
    %50 = arith.select %48, %49, %38 : vector<8x8xi1>, vector<8x8xf32>
    %cst_16 = arith.constant dense<0xFF800000> : vector<8xf32>
    %51 = vector.multi_reduction <maximumf>, %50, %cst_16 [1] : vector<8x8xf32> to vector<8xf32>
    %52 = vector.shape_cast %51 : vector<8xf32> to vector<8x1xf32>
    %53 = vector.broadcast %52 : vector<8x1xf32> to vector<8x8xf32>
    %54 = arith.cmpf oeq, %50, %53 : vector<8x8xf32>
    %c8_i32_17 = arith.constant 8 : i32
    %55 = vector.broadcast %c8_i32_17 : i32 to vector<8x8xi32>
    %56 = arith.select %54, %26, %55 : vector<8x8xi1>, vector<8x8xi32>
    %cst_18 = arith.constant dense<2147483647> : vector<8xi32>
    %57 = vector.multi_reduction <minsi>, %56, %cst_18 [1] : vector<8x8xi32> to vector<8xi32>
    %58 = vector.shape_cast %57 : vector<8xi32> to vector<8x1xi32>
    %59 = vector.broadcast %58 : vector<8x1xi32> to vector<8x8xi32>
    %60 = arith.cmpi eq, %26, %59 : vector<8x8xi32>
    %cst_19 = arith.constant -1.000000e+00 : f32
    %61 = vector.broadcast %cst_19 : f32 to vector<8x8xf32>
    %62 = arith.select %60, %61, %50 : vector<8x8xi1>, vector<8x8xf32>
    %cst_20 = arith.constant -1.000000e+00 : f32
    %63 = vector.broadcast %cst_20 : f32 to vector<8x8xf32>
    %64 = arith.cmpf oeq, %62, %63 : vector<8x8xf32>
    %cst_21 = arith.constant 1.000000e+00 : f32
    %65 = vector.broadcast %cst_21 : f32 to vector<8x8xf32>
    %66 = arith.subf %22, %65 : vector<8x8xf32>
    %67 = vector.broadcast %25 : vector<8x1xf32> to vector<8x8xf32>
    %68 = arith.mulf %66, %67 : vector<8x8xf32>
    %69 = math.exp %68 : vector<8x8xf32>
    %cst_22 = arith.constant 0.000000e+00 : f32
    %70 = vector.broadcast %cst_22 : f32 to vector<8x8xf32>
    %71 = arith.select %64, %69, %70 : vector<8x8xi1>, vector<8x8xf32>
    %cst_23 = arith.constant dense<0.000000e+00> : vector<8xf32>
    %72 = vector.multi_reduction <add>, %71, %cst_23 [1] : vector<8x8xf32> to vector<8xf32>
    %73 = vector.shape_cast %72 : vector<8xf32> to vector<8x1xf32>
    %74 = tpu.reciprocal %73 : vector<8x1xf32> -> vector<8x1xf32>
    %75 = vector.broadcast %74 : vector<8x1xf32> to vector<8x8xf32>
    %76 = arith.mulf %71, %75 : vector<8x8xf32>
    %cst_24 = arith.constant dense<0.000000e+00> : vector<8x32xf32>
    %77 = tpu.matmul %76, %0, %cst_24 {dimension_numbers = #tpu.dot_dimension_numbers<[1], [0], [0], [1], [0, 0, 1, 1], [], []>} : vector<8x8xf32>, vector<8x32xf32>, vector<8x32xf32> -> vector<8x32xf32>
    %c0_25 = arith.constant 0 : index
    %c0_26 = arith.constant 0 : index
    %78 = vector.load %arg3[%c0_25, %c0_26] : memref<8x32xf32, #tpu.memory_space<vmem>>, vector<8x32xf32>
    tpu.vector_store %arg3[%c0_25, %c0_26], %77 {strides = array<i32>} : memref<8x32xf32, #tpu.memory_space<vmem>>, vector<8x32xf32>,
    return
  }
  func.func @transform_0(%arg0: i32) -> (i32, i32) {
    %c0_i32 = arith.constant 0 : i32
    %c0_i32_0 = arith.constant 0 : i32
    %c0_i32_1 = arith.constant 0 : i32
    return %c0_i32, %c0_i32_0 : i32, i32
  }
  func.func @transform_1(%arg0: i32) -> (i32, i32) {
    %c0_i32 = arith.constant 0 : i32
    %c0_i32_0 = arith.constant 0 : i32
    %c0_i32_1 = arith.constant 0 : i32
    return %c0_i32, %c0_i32_0 : i32, i32
  }
  func.func @transform_2(%arg0: i32) -> (i32, i32) {
    %c0_i32 = arith.constant 0 : i32
    %c0_i32_0 = arith.constant 0 : i32
    return %arg0, %c0_i32 : i32, i32
  }
}

</mosaic_0001>

<bundles_post_ra>
// kernel: tpu_custom_call.1
= control target key start
LH: loop header
LB: loop body
LE: loop exit
PB: predicated region body
PF: predicated region fallthrough
CT: control target
= control target key end

     0   :  { %7 = vsyncpa [#allocation3], 0  ;;  %s433_s0 = inlined_call_operand.hbm [shape: f32[8,32], index: 0, kind: input, shape index: {}]   ;;  %s434_s1 = inlined_call_operand.vmem [shape: f32[1,8], index: 1, kind: input, shape index: {}]   ;;  %s435_s2 = inlined_call_operand.hbm [shape: f32[8,32], index: 2, kind: output, shape index: {}]  }
   0x1   :  { %8 = vsyncpa [#allocation4], 0  ;;  %s376_s9 = smov [#allocation2]  }
   0x2   :  { %s15_s10 = sshll.u32 %s376_s9, 4  ;;  %s16_s10 = int_to_ptr.vmem [resolvable:$true] %s15_s10 }
   0x3   :  { %s340_s11 = scalar_lea.vmem %s16_s10, 128  ;;  %p345_p1 = scmp.lt.s32.totalorder %s16_s10, %s16_s10 }
   0x4   :  { %p341_p0 = scmp.ne.s32.totalorder %s16_s10, %s340_s11  ;;  %p346_p2 = scmp.lt.s32.totalorder %s340_s11, %s340_s11 }
   0x6   :  { %p347_p3 = por %p346_p2, %p345_p1 }
   0x8   :  { %p348_p4 = pnand %p347_p3, %p341_p0 }
   0xa   :  { %351 = shalt.err (!%p348_p4)
}
   0xb   :  { %18 = dma.hbm_to_vmem [thread:$0]  %s433_s0, 128, %s16_s10, [#allocation3]  }
   0xc   :  { %372 = dma.done.wait [#allocation3], 128  }
   0xd   :  { %373 = vsyncadd [#allocation3], 4294967168  ;;  %v28_v0 = vld [vmem:[#allocation2] sm:$0xff]  ;;  %vm30_vm0 = vcmask 261120   ;;  %v377_v3 = vmov 0.0   ;;  %vm378_vm1 = vmmov 0   ;;  %v131_v18 = vlaneseq }
   0xe   :  { %v29_v1 = vmul.f32 %v28_v0, %v28_v0  ;;  %308 = vmatprep.subr.mxu0 %v377_v3  ;;  %310 = vmatprep.mubr.msk.f32.mxu0 %vm378_vm1, %v377_v3  ;;  %v301_v8 = vld [vmem:[%s434_s1] ss:$0 sm:$0xff]  ;;  %vm120_vm2 = vcmask 64512   ;;  %s379_s1 = smov [#allocation5]  }
   0xf   :  { %309 = vmatpush3.xpose.msk.msra.mxu0 %vm30_vm0, %v28_v0  ;;  %313 = vmatprep.subr.mxu1 %v377_v3  ;;  %v409_v19 = vand.u32 127, %v131_v18  ;;  %s290_s15 = sshll.u32 %s379_s1, 4  ;;  %s291_s15 = int_to_ptr.vmem [resolvable:$true] %s290_s15 }
  0x10   :  { %v31_v2 = vsel %vm30_vm0, %v29_v1, 0.0  ;;  %314 = vmatpush3.msra.mxu1 %v28_v0  ;;  %315 = vmatprep.mubr.msk.f32.mxu1 %vm378_vm1, %v377_v3  ;;  %s352_s16 = scalar_lea.vmem %s291_s15, 128  ;;  %p357_p6 = scmp.lt.s32.totalorder %s291_s15, %s291_s15 }
  0x11   :  { %32 = vadd.xlane.f32.xlu0 %v31_v2  ;;  %p353_p5 = scmp.ne.s32.totalorder %s291_s15, %s352_s16  ;;  %p358_p7 = scmp.lt.s32.totalorder %s352_s16, %s352_s16 }
  0x13   :  { %p359_p8 = por %p358_p7, %p357_p6 }
  0x15   :  { %p360_p9 = pnand %p359_p8, %p353_p5 }
  0x9a   :  { %v33_v4 = vpop.xlane.xlu0 %32 }
  0x9b   :  { %v34_v5 = vadd.f32 3.2e-05, %v33_v4 }
  0x9d   :  { %322 = vrsqrt.f32 %v34_v5 }
  0xaa   :  { %v323_v6 = vpop.eup %322 }
  0xab   :  { %v36_v7 = vmul.f32 %v323_v6, %v28_v0 }
  0xad   :  { %311 = vmatmul.mubr.msk.f32.vlgmr.msra.gmra.mxu0 %vm30_vm0, %v36_v7 }
 0x16d   :  { %v109_v9 = vpop.f32.mrf.mxu0 }
 0x16e   :  { %v119_v10 = vmul.f32 %v301_v8, %v109_v9 }
 0x16f   :  { %v312_v11 = vpop.f32.mrf.mxu0 }
 0x170   :  { %v121_v12 = vsel %vm120_vm2, %v119_v10, -inf }
 0x171   :  { %122 = vmax.xlane.f32.xlu0 %v121_v12 }
 0x1fa   :  { %v123_v13 = vpop.xlane.xlu0 %122 }
 0x1fb   :  { %v124_v14 = vsub.f32 %v119_v10, %v123_v13 }
 0x1fd   :  { %v125_v15 = vmul.f32 1.442695, %v124_v14 }
 0x1ff   :  { %324 = vpow2.f32 %v125_v15 }
 0x20c   :  { %v405_v16 = vpop.eup %324 }
 0x20d   :  { %v133_v17 = vsel %vm120_vm2, %v405_v16, -inf  ;;  %v127_v52 = vsel %vm120_vm2, %v405_v16, 0.0  ;;  %v302_v0 = vadd.f32 -1.0, %v405_v16 }
 0x20e   :  { %134 = vmax.xlane.f32.xlu1 %v133_v17 }
 0x297   :  { %v135_v20 = vpop.xlane.xlu1 %134 }
 0x298   :  { %vm136_vm3 = vcmp.eq.f32.partialorder %v405_v16, %v135_v20 }
 0x299   :  { %v137_v21 = vsel %vm136_vm3, %v409_v19, 8 }
 0x29a   :  { %v138_v22 = vsel %vm120_vm2, %v137_v21, 2147483647 }
 0x29b   :  { %v140_v23 = vshra.s32 %v138_v22, 16  ;;  %v139_v25 = vand.u32 65535, %v138_v22 }
 0x29d   :  { %v142_v24 = vcvt.s32.f32 %v140_v23  ;;  %v141_v27 = vcvt.s32.f32 %v139_v25 }
 0x29f   :  { %143 = vmin.xlane.f32.xlu1 %v142_v24 }
 0x328   :  { %v144_v26 = vpop.xlane.xlu1 %143 }
 0x329   :  { %vm145_vm4 = vcmp.eq.f32.partialorder %v142_v24, %v144_v26  ;;  %v150_v29 = vcvt.f32.s32 %v144_v26 }
 0x32a   :  { %v146_v28 = vsel %vm145_vm4, %v141_v27, inf }
 0x32b   :  { %147 = vmin.xlane.f32.xlu0 %v146_v28  ;;  %v151_v31 = vshll.u32 %v150_v29, 16 }
 0x3b4   :  { %v148_v30 = vpop.xlane.xlu0 %147 }
 0x3b5   :  { %v149_v32 = vcvt.f32.s32 %v148_v30 }
 0x3b7   :  { %v152_v33 = vadd.s32 %v151_v31, %v149_v32 }
 0x3b9   :  { %vm153_vm5 = vcmp.eq.s32.totalorder %v409_v19, %v152_v33 }
 0x3ba   :  { %v154_v34 = vsel %vm153_vm5, -1.0, %v405_v16 }
 0x3bb   :  { %v155_v35 = vsel %vm120_vm2, %v154_v34, -inf }
 0x3bc   :  { %156 = vmax.xlane.f32.xlu1 %v155_v35 }
 0x445   :  { %v157_v36 = vpop.xlane.xlu1 %156 }
 0x446   :  { %vm158_vm6 = vcmp.eq.f32.partialorder %v154_v34, %v157_v36 }
 0x447   :  { %v159_v37 = vsel %vm158_vm6, %v409_v19, 8 }
 0x448   :  { %v160_v38 = vsel %vm120_vm2, %v159_v37, 2147483647 }
 0x449   :  { %v162_v39 = vshra.s32 %v160_v38, 16  ;;  %v161_v41 = vand.u32 65535, %v160_v38 }
 0x44b   :  { %v164_v40 = vcvt.s32.f32 %v162_v39  ;;  %v163_v43 = vcvt.s32.f32 %v161_v41 }
 0x44d   :  { %165 = vmin.xlane.f32.xlu0 %v164_v40 }
 0x4d6   :  { %v166_v42 = vpop.xlane.xlu0 %165 }
 0x4d7   :  { %vm167_vm7 = vcmp.eq.f32.partialorder %v164_v40, %v166_v42  ;;  %v172_v45 = vcvt.f32.s32 %v166_v42 }
 0x4d8   :  { %v168_v44 = vsel %vm167_vm7, %v163_v43, inf }
 0x4d9   :  { %169 = vmin.xlane.f32.xlu1 %v168_v44  ;;  %v173_v47 = vshll.u32 %v172_v45, 16 }
 0x562   :  { %v170_v46 = vpop.xlane.xlu1 %169 }
 0x563   :  { %v171_v48 = vcvt.f32.s32 %v170_v46 }
 0x565   :  { %v174_v49 = vadd.s32 %v173_v47, %v171_v48 }
 0x567   :  { %vm175_vm8 = vcmp.eq.s32.totalorder %v409_v19, %v174_v49 }
 0x568   :  { %v176_v50 = vsel %vm175_vm8, -1.0, %v154_v34 }
 0x569   :  { %v177_v51 = vsel %vm120_vm2, %v176_v50, -inf }
 0x56a   :  { %178 = vmax.xlane.f32.xlu0 %v177_v51 }
 0x56e   :  { %128 = vadd.xlane.f32.xlu0 %v127_v52 }
 0x5f3   :  { %v179_v53 = vpop.xlane.xlu0 %178 }
 0x5f4   :  { %vm180_vm9 = vcmp.eq.f32.partialorder %v176_v50, %v179_v53 }
 0x5f5   :  { %v181_v54 = vsel %vm180_vm9, %v409_v19, 8 }
 0x5f6   :  { %v182_v55 = vsel %vm120_vm2, %v181_v54, 2147483647 }
 0x5f7   :  { %v184_v56 = vshra.s32 %v182_v55, 16  ;;  %v183_v58 = vand.u32 65535, %v182_v55  ;;  %v129_v62 = vpop.xlane.xlu0 %128 }
 0x5f8   :  { %326 = vrcp.f32 %v129_v62 }
 0x5f9   :  { %v186_v57 = vcvt.s32.f32 %v184_v56  ;;  %v185_v60 = vcvt.s32.f32 %v183_v58 }
 0x5fb   :  { %187 = vmin.xlane.f32.xlu1 %v186_v57 }
 0x605   :  { %v327_v63 = vpop.eup %326 }
 0x606   :  { %v201_v1 = vmul.f32 %v327_v63, %v302_v0 }
 0x608   :  { %v202_v2 = vmul.f32 1.442695, %v201_v1 }
 0x60a   :  { %328 = vpow2.f32 %v202_v2 }
 0x617   :  { %v329_v9 = vpop.eup %328 }
 0x684   :  { %v188_v59 = vpop.xlane.xlu1 %187 }
 0x685   :  { %vm189_vm10 = vcmp.eq.f32.partialorder %v186_v57, %v188_v59  ;;  %v194_v3 = vcvt.f32.s32 %v188_v59 }
 0x686   :  { %v190_v61 = vsel %vm189_vm10, %v185_v60, inf }
 0x687   :  { %191 = vmin.xlane.f32.xlu1 %v190_v61  ;;  %v195_v5 = vshll.u32 %v194_v3, 16 }
 0x710   :  { %v192_v4 = vpop.xlane.xlu1 %191 }
 0x711   :  { %v193_v6 = vcvt.f32.s32 %v192_v4 }
 0x713   :  { %v196_v7 = vadd.s32 %v195_v5, %v193_v6 }
 0x715   :  { %vm197_vm11 = vcmp.eq.s32.totalorder %v409_v19, %v196_v7 }
 0x716   :  { %v198_v8 = vsel %vm197_vm11, -1.0, %v176_v50 }
 0x717   :  { %vm199_vm12 = vcmp.eq.f32.partialorder %v198_v8, -1.0 }
 0x718   :  { %v204_v10 = vsel %vm199_vm12, %v329_v9, 0.0 }
 0x719   :  { %v205_v11 = vsel %vm120_vm2, %v204_v10, 0.0 }
 0x71a   :  { %206 = vadd.xlane.f32.xlu0 %v205_v11 }
 0x7a3   :  { %v207_v12 = vpop.xlane.xlu0 %206 }
 0x7a4   :  { %330 = vrcp.f32 %v207_v12 }
 0x7b1   :  { %v331_v13 = vpop.eup %330 }
 0x7b2   :  { %v209_v14 = vmul.f32 %v331_v13, %v204_v10 }
 0x7b4   :  { %316 = vmatmul.mubr.msk.f32.vlgmr.msra.gmra.mxu1 %vm120_vm2, %v209_v14 }
 0x874   :  { %v279_v15 = vpop.f32.mrf.mxu1 }
 0x875   :  { %283 = vst.msk [vmem:[#allocation5] sm:$0xff] %vm30_vm0, %v279_v15 }
 0x876   :  { %v317_v16 = vpop.f32.mrf.mxu1 }
 0x877   :  { %363 = shalt.err (!%p360_p9)
}
 0x878   :  { %293 = dma.vmem_to_hbm [thread:$0]  %s291_s15, 128, %s435_s2, [#allocation4]  }
 0x879   :  { %374 = dma.done.wait [#allocation4], 128  }
 0x87a   :  { %375 = vsyncadd [#allocation4], 4294967168 }
 0x87b   :  { %297 = vsyncpa [#allocation3], 1 }
 0x87c   :  { %298 = vsyncpa [#allocation4], 1 }

</bundles_post_ra>
